<compile_context>
chip_gen: v7x
topology: tpu7x:2x2x1
jax: 0.10.0
libtpu: 0.0.40
codegen_flags: <defaults>
</compile_context>

<pallas_src>
import functools

import jax
import jax.numpy as jnp
from jax import lax
from jax.experimental import pallas as pl
from jax.experimental.pallas import tpu as pltpu


# ---------------------------------------------------------------------------
# Kernels
# ---------------------------------------------------------------------------

def _layernorm_last_kernel(x_ref, w_ref, b_ref, o_ref, *, eps):
    # x_ref: (tm, C), w_ref/b_ref: (1, C), o_ref: (tm, C). Normalize over lanes.
    x = x_ref[...].astype(jnp.float32)
    mean = jnp.mean(x, axis=-1, keepdims=True)
    xc = x - mean
    var = jnp.mean(xc * xc, axis=-1, keepdims=True)     # biased var (PyTorch)
    inv = lax.rsqrt(var + eps)                           # EUP rsqrt
    y = xc * inv
    y = y * w_ref[...].astype(jnp.float32) + b_ref[...].astype(jnp.float32)
    o_ref[...] = y.astype(o_ref.dtype)


def _layernorm_first_kernel(x_ref, w_ref, b_ref, o_ref, *, eps):
    # x_ref: (1, C, t_hw), w_ref/b_ref: (C, 1). Normalize over the sublane C axis.
    x = x_ref[...].astype(jnp.float32)
    mean = jnp.mean(x, axis=1, keepdims=True)            # XLU sublane reduction
    xc = x - mean
    var = jnp.mean(xc * xc, axis=1, keepdims=True)
    inv = lax.rsqrt(var + eps)
    y = xc * inv
    w = w_ref[...].astype(jnp.float32)                   # (C, 1) -> broadcasts
    b = b_ref[...].astype(jnp.float32)
    y = y * w + b
    o_ref[...] = y.astype(o_ref.dtype)


# ---------------------------------------------------------------------------
# Tiling helpers
# ---------------------------------------------------------------------------

_X_TILE_BYTES = 2 * 1024 * 1024   # per x tile; in+out double-buffered <= 8 MiB


def _sublane_pack(dtype):
    # 8 rows for 32-bit, 16 for bf16/fp16, 32 for int8/fp8.
    return max(8, 32 // jnp.dtype(dtype).itemsize)


def _round_up(x, m):
    return ((x + m - 1) // m) * m


# ---------------------------------------------------------------------------
# Wrappers
# ---------------------------------------------------------------------------

def _layer_norm_channels_last(x, weight, bias, eps):
    orig_shape = x.shape
    C = orig_shape[-1]
    M = 1
    for d in orig_shape[:-1]:
        M *= d
    x2 = x.reshape(M, C)
    w2 = weight.reshape(1, C)
    b2 = bias.reshape(1, C)

    itemsize = jnp.dtype(x.dtype).itemsize
    pack = _sublane_pack(x.dtype)
    # VMEM-budgeted row tile (function of C and dtype), capped at 1024 rows,
    # and capped so the grid has ~8 blocks whenever M is large enough
    # (pipelining + v7x megacore sharding). Ragged M -> partial last block.
    tm_budget = max(pack, (_X_TILE_BYTES // (C * itemsize)) // pack * pack)
    tm_split = _round_up(pl.cdiv(M, 8), pack)
    tm = max(pack, min(tm_budget, tm_split, 1024))
    n_blocks = pl.cdiv(M, tm)

    cost = pl.CostEstimate(
        flops=8 * M * C,
        transcendentals=M,
        bytes_accessed=2 * M * C * itemsize
        + 2 * C * jnp.dtype(weight.dtype).itemsize,
    )

    out = pl.pallas_call(
        functools.partial(_layernorm_last_kernel, eps=float(eps)),
        out_shape=jax.ShapeDtypeStruct((M, C), x.dtype),
        grid=(n_blocks,),
        in_specs=[
            pl.BlockSpec((tm, C), lambda i: (i, 0)),    # x row tile
            pl.BlockSpec((1, C), lambda i: (0, 0)),     # gamma (resident)
            pl.BlockSpec((1, C), lambda i: (0, 0)),     # beta  (resident)
        ],
        out_specs=pl.BlockSpec((tm, C), lambda i: (i, 0)),
        compiler_params=pltpu.CompilerParams(
            dimension_semantics=("parallel",)),
        cost_estimate=cost,
    )(x2, w2, b2)
    return out.reshape(orig_shape)


def _layer_norm_channels_first(x, weight, bias, eps):
    B, C, H, W = x.shape
    HW = H * W
    x3 = x.reshape(B, C, HW)
    w2 = weight.reshape(C, 1)
    b2 = bias.reshape(C, 1)

    itemsize = jnp.dtype(x.dtype).itemsize
    if HW <= 128:
        t_hw = HW                                        # full last dim
    else:
        t_budget = max(128, (_X_TILE_BYTES // (C * itemsize)) // 128 * 128)
        t_hw = min(t_budget, _round_up(HW, 128))         # ragged -> partial block
    n_hw = pl.cdiv(HW, t_hw)

    cost = pl.CostEstimate(
        flops=8 * B * C * HW,
        transcendentals=B * HW,
        bytes_accessed=2 * B * C * HW * itemsize
        + 2 * C * jnp.dtype(weight.dtype).itemsize,
    )

    out = pl.pallas_call(
        functools.partial(_layernorm_first_kernel, eps=float(eps)),
        out_shape=jax.ShapeDtypeStruct((B, C, HW), x.dtype),
        grid=(B, n_hw),
        in_specs=[
            pl.BlockSpec((1, C, t_hw), lambda b, j: (b, 0, j)),  # x pixel tile
            pl.BlockSpec((C, 1), lambda b, j: (0, 0)),           # gamma (resident)
            pl.BlockSpec((C, 1), lambda b, j: (0, 0)),           # beta  (resident)
        ],
        out_specs=pl.BlockSpec((1, C, t_hw), lambda b, j: (b, 0, j)),
        compiler_params=pltpu.CompilerParams(
            dimension_semantics=("parallel", "parallel")),
        cost_estimate=cost,
    )(x3, w2, b2)
    return out.reshape(B, C, H, W)


def layer_norm_pallas(x, weight, bias, *, eps=1e-6, data_format="channels_last"):
    """LayerNorm over the channel dim. weight/bias: shape (C,)."""
    if data_format == "channels_last":
        return _layer_norm_channels_last(x, weight, bias, eps)
    if data_format == "channels_first":
        return _layer_norm_channels_first(x, weight, bias, eps)
    raise NotImplementedError(data_format)


# ---------------------------------------------------------------------------
# Pure-JAX reference
# ---------------------------------------------------------------------------

def layer_norm_reference(x, weight, bias, eps=1e-6, data_format="channels_last"):
    if data_format == "channels_last":
        mean = jnp.mean(x, axis=-1, keepdims=True)
        var = jnp.mean((x - mean) ** 2, axis=-1, keepdims=True)
        return (x - mean) / jnp.sqrt(var + eps) * weight + bias
    else:  # channels_first
        mean = jnp.mean(x, axis=1, keepdims=True)
        var = jnp.mean((x - mean) ** 2, axis=1, keepdims=True)
        xn = (x - mean) / jnp.sqrt(var + eps)
        return weight[:, None, None] * xn + bias[:, None, None]


if __name__ == "__main__":
    key = jax.random.PRNGKey(0)
    ks = jax.random.split(key, 9)

    # --- channels_last, ragged row count (M = 2*7*9 = 126 -> partial block) ---
    B, H, W, C = 2, 7, 9, 32
    x_cl = jax.random.normal(ks[0], (B, H, W, C), dtype=jnp.float32)
    w_cl = 1.0 + 0.1 * jax.random.normal(ks[1], (C,), dtype=jnp.float32)
    b_cl = 0.1 * jax.random.normal(ks[2], (C,), dtype=jnp.float32)
    y_cl = jax.block_until_ready(
        layer_norm_pallas(x_cl, w_cl, b_cl, eps=1e-6, data_format="channels_last"))
    y_cl_ref = layer_norm_reference(x_cl, w_cl, b_cl, 1e-6, "channels_last")
    assert y_cl.shape == x_cl.shape
    assert jnp.allclose(y_cl, y_cl_ref, atol=1e-5, rtol=1e-5), \
        "channels_last mismatch vs reference"

    # --- channels_first: (B, C, H, W), normalized over C in NCHW layout ---
    Bc, Cc, Hc, Wc = 2, 4, 16, 16
    x_cf = jax.random.normal(ks[3], (Bc, Cc, Hc, Wc), dtype=jnp.float32)
    w_cf = 1.0 + 0.1 * jax.random.normal(ks[4], (Cc,), dtype=jnp.float32)
    b_cf = 0.1 * jax.random.normal(ks[5], (Cc,), dtype=jnp.float32)
    y_cf = jax.block_until_ready(
        layer_norm_pallas(x_cf, w_cf, b_cf, eps=1e-6, data_format="channels_first"))
    y_cf_ref = layer_norm_reference(x_cf, w_cf, b_cf, 1e-6, "channels_first")
    assert y_cf.shape == x_cf.shape
    assert jnp.allclose(y_cf, y_cf_ref, atol=1e-5, rtol=1e-5), \
        "channels_first mismatch vs reference"

    # --- channels_last, bf16 (exercises 16-row sublane packing + f32 accum) ---
    Cb = 128
    x_bf = jax.random.normal(ks[6], (2, 8, 8, Cb), dtype=jnp.float32).astype(jnp.bfloat16)
    w_bf = (1.0 + 0.1 * jax.random.normal(ks[7], (Cb,), dtype=jnp.float32)).astype(jnp.bfloat16)
    b_bf = (0.1 * jax.random.normal(ks[8], (Cb,), dtype=jnp.float32)).astype(jnp.bfloat16)
    y_bf = jax.block_until_ready(
        layer_norm_pallas(x_bf, w_bf, b_bf, eps=1e-6, data_format="channels_last"))
    y_bf_ref = layer_norm_reference(
        x_bf.astype(jnp.float32), w_bf.astype(jnp.float32),
        b_bf.astype(jnp.float32), 1e-6, "channels_last")
    assert jnp.allclose(y_bf.astype(jnp.float32), y_bf_ref, atol=3e-2, rtol=3e-2), \
        "channels_last bf16 mismatch vs reference"

    print("KERNEL_OK")
</pallas_src>

<mosaic_0001>
module attributes {stable_mosaic.version = 11 : i64} {
  func.func @_layernorm_last_kernel(%arg0: i32, %arg1: memref<16x32xf32, #tpu.memory_space<vmem>>, %arg2: memref<1x32xf32, #tpu.memory_space<vmem>>, %arg3: memref<1x32xf32, #tpu.memory_space<vmem>>, %arg4: memref<16x32xf32, #tpu.memory_space<vmem>>) attributes {dimension_semantics = [#tpu.dimension_semantics<parallel>], iteration_bounds = array<i64: 8>, scalar_prefetch = 0 : i64, scratch_operands = 0 : i64, tpu.core_type = #tpu.core_type<tc>, window_params = [{transform_indices = @transform_0, window_bounds = array<i64: 16, 32>}, {pipeline_mode = #tpu.pipeline_mode<synchronous>, transform_indices = @transform_1, window_bounds = array<i64: 1, 32>}, {pipeline_mode = #tpu.pipeline_mode<synchronous>, transform_indices = @transform_2, window_bounds = array<i64: 1, 32>}, {transform_indices = @transform_3, window_bounds = array<i64: 16, 32>}]} {
    %c0 = arith.constant 0 : index
    %c0_0 = arith.constant 0 : index
    %0 = vector.load %arg1[%c0, %c0_0] : memref<16x32xf32, #tpu.memory_space<vmem>>, vector<16x32xf32>
    %cst = arith.constant dense<0.000000e+00> : vector<16xf32>
    %1 = vector.multi_reduction <add>, %0, %cst [1] : vector<16x32xf32> to vector<16xf32>
    %2 = vector.shape_cast %1 : vector<16xf32> to vector<16x1xf32>
    %cst_1 = arith.constant 3.200000e+01 : f32
    %3 = vector.broadcast %cst_1 : f32 to vector<16x1xf32>
    %4 = arith.divf %2, %3 : vector<16x1xf32>
    %5 = vector.broadcast %4 : vector<16x1xf32> to vector<16x32xf32>
    %6 = arith.subf %0, %5 : vector<16x32xf32>
    %7 = arith.mulf %6, %6 : vector<16x32xf32>
    %cst_2 = arith.constant dense<0.000000e+00> : vector<16xf32>
    %8 = vector.multi_reduction <add>, %7, %cst_2 [1] : vector<16x32xf32> to vector<16xf32>
    %9 = vector.shape_cast %8 : vector<16xf32> to vector<16x1xf32>
    %cst_3 = arith.constant 3.200000e+01 : f32
    %10 = vector.broadcast %cst_3 : f32 to vector<16x1xf32>
    %11 = arith.divf %9, %10 : vector<16x1xf32>
    %cst_4 = arith.constant 9.99999997E-7 : f32
    %12 = vector.broadcast %cst_4 : f32 to vector<16x1xf32>
    %13 = arith.addf %11, %12 : vector<16x1xf32>
    %14 = math.rsqrt %13 : vector<16x1xf32>
    %15 = vector.broadcast %14 : vector<16x1xf32> to vector<16x32xf32>
    %16 = arith.mulf %6, %15 : vector<16x32xf32>
    %c0_5 = arith.constant 0 : index
    %c0_6 = arith.constant 0 : index
    %17 = vector.load %arg2[%c0_5, %c0_6] : memref<1x32xf32, #tpu.memory_space<vmem>>, vector<1x32xf32>
    %18 = vector.broadcast %17 : vector<1x32xf32> to vector<16x32xf32>
    %19 = arith.mulf %16, %18 : vector<16x32xf32>
    %c0_7 = arith.constant 0 : index
    %c0_8 = arith.constant 0 : index
    %20 = vector.load %arg3[%c0_7, %c0_8] : memref<1x32xf32, #tpu.memory_space<vmem>>, vector<1x32xf32>
    %21 = vector.broadcast %20 : vector<1x32xf32> to vector<16x32xf32>
    %22 = arith.addf %19, %21 : vector<16x32xf32>
    %c0_9 = arith.constant 0 : index
    %c0_10 = arith.constant 0 : index
    %23 = vector.load %arg4[%c0_9, %c0_10] : memref<16x32xf32, #tpu.memory_space<vmem>>, vector<16x32xf32>
    tpu.vector_store %arg4[%c0_9, %c0_10], %22 {strides = array<i32>} : memref<16x32xf32, #tpu.memory_space<vmem>>, vector<16x32xf32>,
    return
  }
  func.func @transform_0(%arg0: i32) -> (i32, i32) {
    %c0_i32 = arith.constant 0 : i32
    %c0_i32_0 = arith.constant 0 : i32
    return %arg0, %c0_i32 : i32, i32
  }
  func.func @transform_1(%arg0: i32) -> (i32, i32) {
    %c0_i32 = arith.constant 0 : i32
    %c0_i32_0 = arith.constant 0 : i32
    %c0_i32_1 = arith.constant 0 : i32
    return %c0_i32, %c0_i32_0 : i32, i32
  }
  func.func @transform_2(%arg0: i32) -> (i32, i32) {
    %c0_i32 = arith.constant 0 : i32
    %c0_i32_0 = arith.constant 0 : i32
    %c0_i32_1 = arith.constant 0 : i32
    return %c0_i32, %c0_i32_0 : i32, i32
  }
  func.func @transform_3(%arg0: i32) -> (i32, i32) {
    %c0_i32 = arith.constant 0 : i32
    %c0_i32_0 = arith.constant 0 : i32
    return %arg0, %c0_i32 : i32, i32
  }
}

</mosaic_0001>

<bundles_post_ra>
// kernel: tpu_custom_call.1
= control target key start
LH: loop header
LB: loop body
LE: loop exit
PB: predicated region body
PF: predicated region fallthrough
CT: control target
= control target key end

     0   :  { %s333_s12 = smov 0   ;;  %s369_s0 = inlined_call_operand.vmem [shape: f32[126,32], index: 0, kind: input, shape index: {}]   ;;  %s370_s1 = inlined_call_operand.vmem [shape: f32[1,32], index: 1, kind: input, shape index: {}]   ;;  %s371_s2 = inlined_call_operand.vmem [shape: f32[1,32], index: 2, kind: input, shape index: {}]   ;;  %s372_s3 = inlined_call_operand.vmem [shape: f32[126,32], index: 3, kind: output, shape index: {}]  }
   0x1 LB: > { %s280_s13 = sadd.s32 4294967295, %s311_s12   ;;  %p284_p0 = scmp.ge.s32.totalorder %s311_s12, 1  ;;  %s311_s12 = sphi %s333_s12, %s13_s12  }
   0x2   : > { %p138_p1 = scmp.lt.s32.totalorder %s311_s12, 9 }
   0x4   : > { %p139_p2 = pnand %p284_p0, %p138_p1 }
   0x5   : > { %s285_s14 = sshll.u32 (!%p139_p2), %s280_s13, 1  ;;  %vm176_vm0 = vcmask (!%p139_p2), 261120   ;;  %v289_v21 = vld [vmem:[%s370_s1] ss:$0 sm:$0xff] (!%p139_p2) }
   0x6   : > { %142 = sbr.rel (%p139_p2) target bundleno = 335 (0x14f), region = 32  ;;  %p163_p3 = scmp.lt.s32.totalorder (!%p139_p2), %s285_s14, 15  ;;  %v290_v23 = vld [vmem:[%s371_s2] ss:$0 sm:$0xff] (!%p139_p2) }
   0xd   : > { %s374_s14 = smov (!%p163_p3, %s285_s14), 15 }
   0xe   : > { %s286_s15 = sshll.u32 %s374_s14, 3 }
   0xf   : > { %s166_s18 = scalar_lea.vmem %s369_s0, %s286_s15  ;;  %s172_s25 = scalar_lea.vmem %s372_s3, %s286_s15 }
  0x10   : > { %v174_v0 = vld [vmem:[%s166_s18] sm:$0xff]  ;;  %v175_v1 = vld [vmem:[%s166_s18 + $0x8] sm:$0xff] }
  0x11   : > { %v177_v2 = vsel %vm176_vm0, %v174_v0, 0.0  ;;  %v180_v3 = vsel %vm176_vm0, %v175_v1, 0.0 }
  0x12   : > { %178 = vadd.xlane.f32.xlu0 %v177_v2 }
  0x16   : > { %181 = vadd.xlane.f32.xlu0 %v180_v3 }
  0x9f   : > { %v179_v4 = vpop.xlane.xlu0 %178 }
  0xa0   : > { %v184_v5 = vmul.f32 0.03125, %v179_v4 }
  0xa2   : > { %v186_v6 = vsub.f32 %v174_v0, %v184_v5 }
  0xa3   : > { %v182_v7 = vpop.xlane.xlu0 %181 }
  0xa4   : > { %v185_v8 = vmul.f32 0.03125, %v182_v7  ;;  %v188_v9 = vmul.f32 %v186_v6, %v186_v6 }
  0xa6   : > { %v187_v10 = vsub.f32 %v175_v1, %v185_v8  ;;  %v190_v11 = vsel %vm176_vm0, %v188_v9, 0.0 }
  0xa7   : > { %191 = vadd.xlane.f32.xlu1 %v190_v11 }
  0xa8   : > { %v189_v12 = vmul.f32 %v187_v10, %v187_v10 }
  0xaa   : > { %v193_v13 = vsel %vm176_vm0, %v189_v12, 0.0 }
  0xab   : > { %194 = vadd.xlane.f32.xlu1 %v193_v13 }
 0x134   : > { %v192_v14 = vpop.xlane.xlu1 %191 }
 0x135   : > { %v196_v15 = vmul.f32 0.03125, %v192_v14 }
 0x137   : > { %v198_v16 = vadd.f32 1e-06, %v196_v15 }
 0x138   : > { %v195_v17 = vpop.xlane.xlu1 %194 }
 0x139   : > { %301 = vrsqrt.f32 %v198_v16  ;;  %v197_v18 = vmul.f32 0.03125, %v195_v17 }
 0x13b   : > { %v199_v19 = vadd.f32 1e-06, %v197_v18 }
 0x13d   : > { %303 = vrsqrt.f32 %v199_v19 }
 0x143   : > { %v302_v20 = vpop.eup %301 }
 0x144   : > { %v202_v22 = vmul.f32 %v302_v20, %v186_v6 }
 0x146   : > { %v211_v24 = vmul.f32 %v289_v21, %v202_v22 }
 0x147   : > { %v304_v25 = vpop.eup %303 }
 0x148   : > { %v220_v26 = vadd.f32 %v290_v23, %v211_v24  ;;  %v203_v27 = vmul.f32 %v304_v25, %v187_v10 }
 0x14a   : > { %222 = vst.msk [vmem:[%s172_s25] sm:$0xff] %vm176_vm0, %v220_v26  ;;  %v212_v28 = vmul.f32 %v289_v21, %v203_v27 }
 0x14c   : > { %v221_v29 = vadd.f32 %v290_v23, %v212_v28 }
 0x14e   : > { %223 = vst.msk [vmem:[%s172_s25 + $0x8] sm:$0xff] %vm176_vm0, %v221_v29 }
 0x14f PF: > { %s13_s12 = sadd.s32 1, %s311_s12  }
 0x150   : > { %p10_p4 = scmp.ge.s32.totalorder %s13_s12, 10  }
 0x152   :  { %12 = sbr.rel (!%p10_p4) target bundleno = 1 (0x1), region = 62 }

</bundles_post_ra>
